<compile_context>
chip_gen: v5e
topology: v5e:2x2
jax: 0.10.0
libtpu: 0.0.40
codegen_flags: <defaults>
</compile_context>

<pallas_src>
import functools

import jax
import jax.numpy as jnp
from jax import lax
from jax.experimental import pallas as pl
from jax.experimental.pallas import tpu as pltpu


def _dqn_kernel(x_ref, w1, b1, w2, b2, w3, b3, w4, b4, out_ref, *,
                fan_out, compute_dtype):
    # x_ref: (TB, fan_in) native layout.  Hidden activations are kept
    # batch-on-lanes: (features, TB).  All matmuls accumulate in f32; bias,
    # ReLU, exp and logsumexp stay f32 (no bf16 VPU/EUP on v5e).
    x = x_ref[...].astype(compute_dtype)                       # (TB, fan_in)

    # Layer 1: contract fan_in (last dim of both) -> (n_hidden, TB).
    h = lax.dot_general(w1[...], x, (((1,), (1,)), ((), ())),
                        preferred_element_type=jnp.float32)
    h = jnp.maximum(h + b1[...], 0.0)

    # Layers 2-3: standard (out,in) @ (in,TB) on the MXU, batch on lanes.
    h = jnp.dot(w2[...], h.astype(compute_dtype),
                preferred_element_type=jnp.float32)
    h = jnp.maximum(h + b2[...], 0.0)
    h = jnp.dot(w3[...], h.astype(compute_dtype),
                preferred_element_type=jnp.float32)
    h = jnp.maximum(h + b3[...], 0.0)

    # Layer 4: contract n_hidden (dim 0 of h, dim 1 of w4) -> (TB, fan_out),
    # i.e. the batch-major output layout, so we can store it directly.
    logits = lax.dot_general(h.astype(compute_dtype), w4[...],
                             (((0,), (1,)), ((), ())),
                             preferred_element_type=jnp.float32) + b4[...]

    if fan_out == 1:
        # torch.exp(self.block(x)); can overflow to inf like the reference.
        out_ref[...] = jnp.exp(logits).astype(out_ref.dtype)
    else:
        # Categorical(logits): normalized log-probs = logits - logsumexp.
        # Reduction is along the (tiny) feature axis per sample row, so
        # ragged-tile garbage rows cannot contaminate valid rows.
        m = jnp.max(logits, axis=-1, keepdims=True)
        lse = jnp.log(jnp.sum(jnp.exp(logits - m), axis=-1, keepdims=True)) + m
        out_ref[...] = (logits - lse).astype(out_ref.dtype)


def dqn_forward(x, params, fan_out, *, block_b=4096,
                compute_dtype=jnp.bfloat16, out_dtype=jnp.float32):
    """x: (B, fan_in); params: [(W,b)] with W:(out,in), b:(out,).

    Returns (B, fan_out) `out_dtype`: exp(MLP(x)) if fan_out == 1, else the
    normalized log-probabilities of Categorical(logits=MLP(x)).
    """
    B, fan_in = x.shape
    (w1, b1), (w2, b2), (w3, b3), (w4, b4) = params
    n_hidden = w1.shape[0]
    f32 = jnp.float32

    # ---- batch tile selection ---------------------------------------------
    # Large tiles amortize the ~0.35us/step pipeline overhead; cap so that
    # (a) >=2 grid steps exist when B allows it (megacore split on v7x), and
    # (b) the lane-padded batch-major buffers keep us under ~18-20 MiB VMEM.
    if B <= 512:
        TB = B                                    # single tile, full extent
    else:
        half = ((B + 1) // 2 + 255) // 256 * 256  # round_up(ceil(B/2), 256)
        TB = min(block_b, half)
    grid = (pl.cdiv(B, TB),)                      # ragged last tile is fine

    # Weights in PyTorch-native (out, in) layout; biases shaped for broadcast:
    # (out, 1) against (out, TB) feature-major, (1, fan_out) against the
    # batch-major logits.  All tiny, one-time casts/reshapes.
    operands = [
        (w1.astype(compute_dtype),
         pl.BlockSpec((n_hidden, fan_in), lambda i: (0, 0))),
        (b1.reshape(n_hidden, 1).astype(f32),
         pl.BlockSpec((n_hidden, 1), lambda i: (0, 0))),
        (w2.astype(compute_dtype),
         pl.BlockSpec((n_hidden, n_hidden), lambda i: (0, 0))),
        (b2.reshape(n_hidden, 1).astype(f32),
         pl.BlockSpec((n_hidden, 1), lambda i: (0, 0))),
        (w3.astype(compute_dtype),
         pl.BlockSpec((n_hidden, n_hidden), lambda i: (0, 0))),
        (b3.reshape(n_hidden, 1).astype(f32),
         pl.BlockSpec((n_hidden, 1), lambda i: (0, 0))),
        (w4.astype(compute_dtype),
         pl.BlockSpec((fan_out, n_hidden), lambda i: (0, 0))),
        (b4.reshape(1, fan_out).astype(f32),
         pl.BlockSpec((1, fan_out), lambda i: (0, 0))),
    ]
    flat_args = [a for a, _ in operands]
    w_specs = [s for _, s in operands]

    in_specs = [pl.BlockSpec((TB, fan_in), lambda i: (i, 0))] + w_specs
    out_spec = pl.BlockSpec((TB, fan_out), lambda i: (i, 0))

    return pl.pallas_call(
        functools.partial(_dqn_kernel, fan_out=fan_out,
                          compute_dtype=compute_dtype),
        out_shape=jax.ShapeDtypeStruct((B, fan_out), out_dtype),
        grid=grid,
        in_specs=in_specs,
        out_specs=out_spec,
        compiler_params=pltpu.CompilerParams(
            dimension_semantics=("parallel",),      # megacore on v7x
            vmem_limit_bytes=32 * 1024 * 1024,      # safe on v5e/v6e/v7x
        ),
    )(x, *flat_args)


def init_params(key, fan_in, fan_out, n_hidden):
    """PyTorch-style Linear init: U(-1/sqrt(in), 1/sqrt(in)).

    Weights in PyTorch's native (out_features, in_features) layout; biases 1-D.
    """
    dims = [(n_hidden, fan_in), (n_hidden, n_hidden),
            (n_hidden, n_hidden), (fan_out, n_hidden)]
    params = []
    for (dout, din) in dims:
        key, kw, kb = jax.random.split(key, 3)
        bound = 1.0 / float(din) ** 0.5
        w = jax.random.uniform(kw, (dout, din), jnp.float32, -bound, bound)
        b = jax.random.uniform(kb, (dout,), jnp.float32, -bound, bound)
        params.append((w, b))
    return params


def _reference(x, params, fan_out):
    h = x
    for i, (w, b) in enumerate(params):
        h = h @ w.T + b
        if i < len(params) - 1:
            h = jnp.maximum(h, 0.0)
    if fan_out == 1:
        return jnp.exp(h)
    return h - jax.nn.logsumexp(h, axis=-1, keepdims=True)


if __name__ == "__main__":
    key = jax.random.PRNGKey(0)
    fan_in, n_hidden = 8, 32

    # --- Categorical head (fan_out=4), tiny batch, exact f32 path -----------
    B, fan_out = 2, 4
    kx, kp, kx2 = jax.random.split(key, 3)
    x = jax.random.normal(kx, (B, fan_in), jnp.float32)
    params = init_params(kp, fan_in, fan_out, n_hidden)

    out = jax.block_until_ready(
        dqn_forward(x, params, fan_out, compute_dtype=jnp.float32))
    ref = _reference(x, params, fan_out)
    assert out.shape == (B, fan_out)
    assert jnp.allclose(out, ref, atol=1e-5, rtol=1e-5)

    # --- default bf16-matmul path (f32 accumulation), looser tolerance ------
    out_bf = jax.block_until_ready(dqn_forward(x, params, fan_out))
    assert jnp.allclose(out_bf, ref, atol=5e-2, rtol=5e-2)

    # --- scalar head (fan_out=1, exp branch), exact f32 path ----------------
    params1 = init_params(kp, fan_in, 1, n_hidden)
    out1 = jax.block_until_ready(
        dqn_forward(x, params1, 1, compute_dtype=jnp.float32))
    ref1 = _reference(x, params1, 1)
    assert out1.shape == (B, 1)
    assert jnp.allclose(out1, ref1, atol=1e-5, rtol=1e-5)

    # --- larger batch: multi-step grid + ragged final tile (1000 % 256 != 0)
    Bbig = 1000
    xb = jax.random.normal(kx2, (Bbig, fan_in), jnp.float32)
    outb = jax.block_until_ready(
        dqn_forward(xb, params, fan_out, block_b=256,
                    compute_dtype=jnp.float32))
    refb = _reference(xb, params, fan_out)
    assert outb.shape == (Bbig, fan_out)
    assert jnp.allclose(outb, refb, atol=1e-5, rtol=1e-5)

    # --- default settings on the larger batch (2 grid steps, bf16 operands) -
    outb_bf = jax.block_until_ready(dqn_forward(xb, params, fan_out))
    assert outb_bf.shape == (Bbig, fan_out)
    assert jnp.allclose(outb_bf, refb, atol=5e-2, rtol=5e-2)

    print("KERNEL_OK")
</pallas_src>

<mosaic_0001>
module attributes {stable_mosaic.version = 11 : i64} {
  func.func @_dqn_kernel(%arg0: i32, %arg1: memref<2x8xf32, #tpu.memory_space<vmem>>, %arg2: memref<32x8xf32, #tpu.memory_space<vmem>>, %arg3: memref<32x1xf32, #tpu.memory_space<vmem>>, %arg4: memref<32x32xf32, #tpu.memory_space<vmem>>, %arg5: memref<32x1xf32, #tpu.memory_space<vmem>>, %arg6: memref<32x32xf32, #tpu.memory_space<vmem>>, %arg7: memref<32x1xf32, #tpu.memory_space<vmem>>, %arg8: memref<4x32xf32, #tpu.memory_space<vmem>>, %arg9: memref<1x4xf32, #tpu.memory_space<vmem>>, %arg10: memref<2x4xf32, #tpu.memory_space<vmem>>) attributes {dimension_semantics = [#tpu.dimension_semantics<parallel>], iteration_bounds = array<i64: 1>, scalar_prefetch = 0 : i64, scratch_operands = 0 : i64, tpu.core_type = #tpu.core_type<tc>, window_params = [{transform_indices = @transform_0, window_bounds = array<i64: 2, 8>}, {pipeline_mode = #tpu.pipeline_mode<synchronous>, transform_indices = @transform_1, window_bounds = array<i64: 32, 8>}, {pipeline_mode = #tpu.pipeline_mode<synchronous>, transform_indices = @transform_2, window_bounds = array<i64: 32, 1>}, {pipeline_mode = #tpu.pipeline_mode<synchronous>, transform_indices = @transform_3, window_bounds = array<i64: 32, 32>}, {pipeline_mode = #tpu.pipeline_mode<synchronous>, transform_indices = @transform_4, window_bounds = array<i64: 32, 1>}, {pipeline_mode = #tpu.pipeline_mode<synchronous>, transform_indices = @transform_5, window_bounds = array<i64: 32, 32>}, {pipeline_mode = #tpu.pipeline_mode<synchronous>, transform_indices = @transform_6, window_bounds = array<i64: 32, 1>}, {pipeline_mode = #tpu.pipeline_mode<synchronous>, transform_indices = @transform_7, window_bounds = array<i64: 4, 32>}, {pipeline_mode = #tpu.pipeline_mode<synchronous>, transform_indices = @transform_8, window_bounds = array<i64: 1, 4>}, {transform_indices = @transform_9, window_bounds = array<i64: 2, 4>}]} {
    %c0 = arith.constant 0 : index
    %c0_0 = arith.constant 0 : index
    %0 = vector.load %arg1[%c0, %c0_0] : memref<2x8xf32, #tpu.memory_space<vmem>>, vector<2x8xf32>
    %c0_1 = arith.constant 0 : index
    %c0_2 = arith.constant 0 : index
    %1 = vector.load %arg2[%c0_1, %c0_2] : memref<32x8xf32, #tpu.memory_space<vmem>>, vector<32x8xf32>
    %cst = arith.constant dense<0.000000e+00> : vector<32x2xf32>
    %2 = tpu.matmul %1, %0, %cst {dimension_numbers = #tpu.dot_dimension_numbers<[1], [1], [0], [0], [0, 0, 1, 0], [], []>} : vector<32x8xf32>, vector<2x8xf32>, vector<32x2xf32> -> vector<32x2xf32>
    %c0_3 = arith.constant 0 : index
    %c0_4 = arith.constant 0 : index
    %3 = vector.load %arg3[%c0_3, %c0_4] : memref<32x1xf32, #tpu.memory_space<vmem>>, vector<32x1xf32>
    %4 = vector.broadcast %3 : vector<32x1xf32> to vector<32x2xf32>
    %5 = arith.addf %2, %4 : vector<32x2xf32>
    %cst_5 = arith.constant 0.000000e+00 : f32
    %6 = vector.broadcast %cst_5 : f32 to vector<32x2xf32>
    %7 = arith.maximumf %5, %6 : vector<32x2xf32>
    %c0_6 = arith.constant 0 : index
    %c0_7 = arith.constant 0 : index
    %8 = vector.load %arg4[%c0_6, %c0_7] : memref<32x32xf32, #tpu.memory_space<vmem>>, vector<32x32xf32>
    %cst_8 = arith.constant dense<0.000000e+00> : vector<32x2xf32>
    %9 = tpu.matmul %8, %7, %cst_8 {dimension_numbers = #tpu.dot_dimension_numbers<[1], [0], [0], [1], [0, 0, 1, 1], [], []>} : vector<32x32xf32>, vector<32x2xf32>, vector<32x2xf32> -> vector<32x2xf32>
    %c0_9 = arith.constant 0 : index
    %c0_10 = arith.constant 0 : index
    %10 = vector.load %arg5[%c0_9, %c0_10] : memref<32x1xf32, #tpu.memory_space<vmem>>, vector<32x1xf32>
    %11 = vector.broadcast %10 : vector<32x1xf32> to vector<32x2xf32>
    %12 = arith.addf %9, %11 : vector<32x2xf32>
    %cst_11 = arith.constant 0.000000e+00 : f32
    %13 = vector.broadcast %cst_11 : f32 to vector<32x2xf32>
    %14 = arith.maximumf %12, %13 : vector<32x2xf32>
    %c0_12 = arith.constant 0 : index
    %c0_13 = arith.constant 0 : index
    %15 = vector.load %arg6[%c0_12, %c0_13] : memref<32x32xf32, #tpu.memory_space<vmem>>, vector<32x32xf32>
    %cst_14 = arith.constant dense<0.000000e+00> : vector<32x2xf32>
    %16 = tpu.matmul %15, %14, %cst_14 {dimension_numbers = #tpu.dot_dimension_numbers<[1], [0], [0], [1], [0, 0, 1, 1], [], []>} : vector<32x32xf32>, vector<32x2xf32>, vector<32x2xf32> -> vector<32x2xf32>
    %c0_15 = arith.constant 0 : index
    %c0_16 = arith.constant 0 : index
    %17 = vector.load %arg7[%c0_15, %c0_16] : memref<32x1xf32, #tpu.memory_space<vmem>>, vector<32x1xf32>
    %18 = vector.broadcast %17 : vector<32x1xf32> to vector<32x2xf32>
    %19 = arith.addf %16, %18 : vector<32x2xf32>
    %cst_17 = arith.constant 0.000000e+00 : f32
    %20 = vector.broadcast %cst_17 : f32 to vector<32x2xf32>
    %21 = arith.maximumf %19, %20 : vector<32x2xf32>
    %c0_18 = arith.constant 0 : index
    %c0_19 = arith.constant 0 : index
    %22 = vector.load %arg8[%c0_18, %c0_19] : memref<4x32xf32, #tpu.memory_space<vmem>>, vector<4x32xf32>
    %cst_20 = arith.constant dense<0.000000e+00> : vector<2x4xf32>
    %23 = tpu.matmul %21, %22, %cst_20 {dimension_numbers = #tpu.dot_dimension_numbers<[0], [1], [1], [0], [0, 1, 1, 0], [], []>} : vector<32x2xf32>, vector<4x32xf32>, vector<2x4xf32> -> vector<2x4xf32>
    %c0_21 = arith.constant 0 : index
    %c0_22 = arith.constant 0 : index
    %24 = vector.load %arg9[%c0_21, %c0_22] : memref<1x4xf32, #tpu.memory_space<vmem>>, vector<1x4xf32>
    %25 = vector.broadcast %24 : vector<1x4xf32> to vector<2x4xf32>
    %26 = arith.addf %23, %25 : vector<2x4xf32>
    %cst_23 = arith.constant dense<0xFF800000> : vector<2xf32>
    %27 = vector.multi_reduction <maximumf>, %26, %cst_23 [1] : vector<2x4xf32> to vector<2xf32>
    %28 = vector.shape_cast %27 : vector<2xf32> to vector<2x1xf32>
    %29 = vector.broadcast %28 : vector<2x1xf32> to vector<2x4xf32>
    %30 = arith.subf %26, %29 : vector<2x4xf32>
    %31 = math.exp %30 : vector<2x4xf32>
    %cst_24 = arith.constant dense<0.000000e+00> : vector<2xf32>
    %32 = vector.multi_reduction <add>, %31, %cst_24 [1] : vector<2x4xf32> to vector<2xf32>
    %33 = vector.shape_cast %32 : vector<2xf32> to vector<2x1xf32>
    %34 = math.log %33 : vector<2x1xf32>
    %35 = arith.addf %34, %28 : vector<2x1xf32>
    %36 = vector.broadcast %35 : vector<2x1xf32> to vector<2x4xf32>
    %37 = arith.subf %26, %36 : vector<2x4xf32>
    %c0_25 = arith.constant 0 : index
    %c0_26 = arith.constant 0 : index
    %38 = vector.load %arg10[%c0_25, %c0_26] : memref<2x4xf32, #tpu.memory_space<vmem>>, vector<2x4xf32>
    tpu.vector_store %arg10[%c0_25, %c0_26], %37 {strides = array<i32>} : memref<2x4xf32, #tpu.memory_space<vmem>>, vector<2x4xf32>,
    return
  }
  func.func @transform_0(%arg0: i32) -> (i32, i32) {
    %c0_i32 = arith.constant 0 : i32
    %c0_i32_0 = arith.constant 0 : i32
    return %arg0, %c0_i32 : i32, i32
  }
  func.func @transform_1(%arg0: i32) -> (i32, i32) {
    %c0_i32 = arith.constant 0 : i32
    %c0_i32_0 = arith.constant 0 : i32
    %c0_i32_1 = arith.constant 0 : i32
    return %c0_i32, %c0_i32_0 : i32, i32
  }
  func.func @transform_2(%arg0: i32) -> (i32, i32) {
    %c0_i32 = arith.constant 0 : i32
    %c0_i32_0 = arith.constant 0 : i32
    %c0_i32_1 = arith.constant 0 : i32
    return %c0_i32, %c0_i32_0 : i32, i32
  }
  func.func @transform_3(%arg0: i32) -> (i32, i32) {
    %c0_i32 = arith.constant 0 : i32
    %c0_i32_0 = arith.constant 0 : i32
    %c0_i32_1 = arith.constant 0 : i32
    return %c0_i32, %c0_i32_0 : i32, i32
  }
  func.func @transform_4(%arg0: i32) -> (i32, i32) {
    %c0_i32 = arith.constant 0 : i32
    %c0_i32_0 = arith.constant 0 : i32
    %c0_i32_1 = arith.constant 0 : i32
    return %c0_i32, %c0_i32_0 : i32, i32
  }
  func.func @transform_5(%arg0: i32) -> (i32, i32) {
    %c0_i32 = arith.constant 0 : i32
    %c0_i32_0 = arith.constant 0 : i32
    %c0_i32_1 = arith.constant 0 : i32
    return %c0_i32, %c0_i32_0 : i32, i32
  }
  func.func @transform_6(%arg0: i32) -> (i32, i32) {
    %c0_i32 = arith.constant 0 : i32
    %c0_i32_0 = arith.constant 0 : i32
    %c0_i32_1 = arith.constant 0 : i32
    return %c0_i32, %c0_i32_0 : i32, i32
  }
  func.func @transform_7(%arg0: i32) -> (i32, i32) {
    %c0_i32 = arith.constant 0 : i32
    %c0_i32_0 = arith.constant 0 : i32
    %c0_i32_1 = arith.constant 0 : i32
    return %c0_i32, %c0_i32_0 : i32, i32
  }
  func.func @transform_8(%arg0: i32) -> (i32, i32) {
    %c0_i32 = arith.constant 0 : i32
    %c0_i32_0 = arith.constant 0 : i32
    %c0_i32_1 = arith.constant 0 : i32
    return %c0_i32, %c0_i32_0 : i32, i32
  }
  func.func @transform_9(%arg0: i32) -> (i32, i32) {
    %c0_i32 = arith.constant 0 : i32
    %c0_i32_0 = arith.constant 0 : i32
    return %arg0, %c0_i32 : i32, i32
  }
}

</mosaic_0001>

<bundles_post_ra>
// kernel: tpu_custom_call.1
= control target key start
LH: loop header
LB: loop body
LE: loop exit
PB: predicated region body
PF: predicated region fallthrough
CT: control target
= control target key end

     0   :  { %vm62_vm0 = vcmask 64512   ;;  %v404_v3 = vmov 0   ;;  %s558_s0 = inlined_call_operand.vmem [shape: f32[2,8], index: 0, kind: input, shape index: {}]   ;;  %s559_s1 = inlined_call_operand.vmem [shape: f32[32,8], index: 1, kind: input, shape index: {}]   ;;  %s560_s2 = inlined_call_operand.vmem [shape: f32[32,1], index: 2, kind: input, shape index: {}]   ;;  %s561_s3 = inlined_call_operand.vmem [shape: f32[32,32], index: 3, kind: input, shape index: {}]   ;;  %s562_s4 = inlined_call_operand.vmem [shape: f32[32,1], index: 4, kind: input, shape index: {}]   ;;  %s563_s5 = inlined_call_operand.vmem [shape: f32[32,32], index: 5, kind: input, shape index: {}]   ;;  %s564_s6 = inlined_call_operand.vmem [shape: f32[32,1], index: 6, kind: input, shape index: {}]   ;;  %s565_s7 = inlined_call_operand.vmem [shape: f32[4,32], index: 7, kind: input, shape index: {}]   ;;  %s566_s8 = inlined_call_operand.vmem [shape: f32[1,4], index: 8, kind: input, shape index: {}]   ;;  %s567_s9 = inlined_call_operand.hbm [shape: f32[2,4], index: 9, kind: output, shape index: {}]  }
   0x1   :  { %v33_v0 = vld [vmem:[%s558_s0] sm:$0x3]  ;;  %v39_v1 = vld [vmem:[%s560_s2 + $0x8] sm:$0xff]  ;;  %371 = vset.pattern.permute.xlu1 %v404_v3  ;;  %v41_v4 = vld [vmem:[%s560_s2 + $0x18] sm:$0xff]  ;;  %370 = vset.pattern.permute.xlu0 %v404_v3 }
   0x2   :  { %352 = vmatpush.xpose.msk.msra.mxu0 %vm62_vm0, %v33_v0  ;;  %v34_v2 = vld [vmem:[%s559_s1] sm:$0xff]  ;;  %49 = vperm.xlu1 %371, %v39_v1  }
   0x3   :  { %59 = vperm.xlu0 %370, %v41_v4   ;;  %372 = vset.pattern.permute.xlu2 %v404_v3 }
   0x5   :  { %353 = vmatmul.msk.f32.vlgmr.msra.gmra.mxu0 %vm62_vm0, %v34_v2 }
   0x6   :  { %14 = vsyncpa [#allocation3], 0  ;;  %v38_v5 = vld [vmem:[%s560_s2] sm:$0xff]  ;;  %v40_v6 = vld [vmem:[%s560_s2 + $0x10] sm:$0xff]  ;;  %vm139_vm1 = vcmask 261120   ;;  %vm321_vm2 = vcmask 25600  }
   0x7   :  { %v35_v7 = vld [vmem:[%s559_s1 + $0x8] sm:$0xff]  ;;  %v115_v8 = vld [vmem:[%s562_s4] sm:$0xff]  ;;  %v36_v10 = vld [vmem:[%s559_s1 + $0x10] sm:$0xff]  ;;  %s405_s11 = smov [#allocation2]  }
   0x8   :  { %v116_v9 = vld [vmem:[%s562_s4 + $0x8] sm:$0xff]  ;;  %v191_v11 = vld [vmem:[%s564_s6 + $0x10] sm:$0xff]  ;;  %v37_v13 = vld [vmem:[%s559_s1 + $0x18] sm:$0xff]  ;;  %s343_s1 = sshll.u32 %s567_s9, 4  ;;  %s344_s1 = int_to_ptr.hbm [resolvable:$true] %s343_s1 }
   0x9   :  { %v190_v12 = vld [vmem:[%s564_s6 + $0x8] sm:$0xff]  ;;  %v118_v26 = vld [vmem:[%s562_s4 + $0x18] sm:$0xff]  ;;  %v111_v31 = vld [vmem:[%s561_s3] sm:$0xff] }
   0xa   :  { %44 = vperm.xlu1 %371, %v38_v5   ;;  %136 = vperm.xlu2 %372, %v118_v26   ;;  %v117_v32 = vld [vmem:[%s562_s4 + $0x10] sm:$0xff]  ;;  %v112_v33 = vld [vmem:[%s561_s3 + $0x8] sm:$0xff]  ;;  %v189_v34 = vld [vmem:[%s564_s6] sm:$0xff] }
   0xb   :  { %54 = vperm.xlu0 %370, %v40_v6   ;;  %v113_v35 = vld [vmem:[%s561_s3 + $0x10] sm:$0xff]  ;;  %v192_v36 = vld [vmem:[%s564_s6 + $0x18] sm:$0xff]  ;;  %v185_v54 = vld [vmem:[%s563_s5] sm:$0xff] }
   0xc   :  { %v114_v37 = vld [vmem:[%s561_s3 + $0x18] sm:$0xff]  ;;  %v186_v55 = vld [vmem:[%s563_s5 + $0x8] sm:$0xff]  ;;  %v187_v56 = vld [vmem:[%s563_s5 + $0x10] sm:$0xff] }
   0xd   :  { %354 = vmatmul.msk.f32.gmra.mxu0 %vm62_vm0, %v35_v7  ;;  %v188_v57 = vld [vmem:[%s563_s5 + $0x18] sm:$0xff]  ;;  %v258_v58 = vld [vmem:[%s565_s7] sm:$0xf] }
   0xe   :  { %365 = vmatpush.xpose.msk.msra.mxu3 %vm139_vm1, %v258_v58 }
  0x12   :  { %121 = vperm.xlu1 %371, %v115_v8   ;;  %131 = vperm.xlu2 %372, %v117_v32  }
  0x13   :  { %126 = vperm.xlu0 %370, %v116_v9  }
  0x15   :  { %355 = vmatmul.msk.f32.gmra.mxu0 %vm62_vm0, %v36_v10 }
  0x1a   :  { %205 = vperm.xlu1 %371, %v191_v11   ;;  %195 = vperm.xlu2 %372, %v189_v34  }
  0x1b   :  { %200 = vperm.xlu0 %370, %v190_v12   ;;  %v373_v12 = vld [vmem:[%s566_s8] ss:$0 sm:$0xff]  ;;  %s341_s8 = sshll.u32 %s405_s11, 4  ;;  %s342_s8 = int_to_ptr.vmem [resolvable:$true] %s341_s8 }
  0x1d   :  { %356 = vmatmul.msk.f32.gmra.mxu0 %vm62_vm0, %v37_v13 }
  0x22   :  { %210 = vperm.xlu2 %372, %v192_v36  }
  0x64   :  { %v137_v40 = vpop.permute.xlu2 %136 }
  0x6c   :  { %v132_v42 = vpop.permute.xlu2 %131 }
  0x74   :  { %v50_v17 = vpop.permute.xlu1 %49  ;;  %v196_v59 = vpop.permute.xlu2 %195 }
  0x75   :  { %v60_v16 = vpop.permute.xlu0 %59 }
  0x7c   :  { %v45_v23 = vpop.permute.xlu1 %44  ;;  %v211_v7 = vpop.permute.xlu2 %210 }
  0x7d   :  { %v55_v19 = vpop.permute.xlu0 %54 }
  0x82   :  { %v95_v14 = vpop.f32.mrf.mxu0 }
  0x83   :  { %v96_v27 = vadd.f32 %v95_v14, %v45_v23 }
  0x84   :  { %v122_v49 = vpop.permute.xlu1 %121 }
  0x85   :  { %v107_v30 = vmax.f32 %v96_v27, 0.0  ;;  %v127_v46 = vpop.permute.xlu0 %126 }
  0x8a   :  { %v98_v15 = vpop.f32.mrf.mxu0 }
  0x8b   :  { %v99_v24 = vadd.f32 %v98_v15, %v50_v17 }
  0x8c   :  { %v206_v3 = vpop.permute.xlu1 %205 }
  0x8d   :  { %v108_v29 = vmax.f32 %v99_v24, 0.0  ;;  %v201_v63 = vpop.permute.xlu0 %200 }
  0x92   :  { %v101_v18 = vpop.f32.mrf.mxu0 }
  0x93   :  { %v102_v21 = vadd.f32 %v101_v18, %v55_v19 }
  0x95   :  { %v109_v28 = vmax.f32 %v102_v21, 0.0 }
  0x9a   :  { %v104_v20 = vpop.f32.mrf.mxu0 }
  0x9b   :  { %v105_v22 = vadd.f32 %v104_v20, %v60_v16 }
  0x9d   :  { %v110_v25 = vmax.f32 %v105_v22, 0.0 }
  0x9f   :  { %164 = vmatpush.msra.mxu1 %v110_v25 }
  0xa1   :  { %165 = vmatpush.msra.mxu1 %v109_v28 }
  0xa3   :  { %166 = vmatpush.msra.mxu1 %v108_v29 }
  0xa5   :  { %167 = vmatpush.msra.mxu1 %v107_v30 }
  0xa6   :  { %357 = vmatmul.msk.f32.vlgmr.msra.gmra.mxu1 %vm139_vm1, %v111_v31 }
  0xae   :  { %358 = vmatmul.msk.f32.gmra.mxu1 %vm139_vm1, %v112_v33 }
  0xb6   :  { %359 = vmatmul.msk.f32.gmra.mxu1 %vm139_vm1, %v113_v35 }
  0xbe   :  { %360 = vmatmul.msk.f32.gmra.mxu1 %vm139_vm1, %v114_v37 }
 0x123   :  { %v169_v38 = vpop.f32.mrf.mxu1 }
 0x124   :  { %v170_v50 = vadd.f32 %v169_v38, %v122_v49 }
 0x126   :  { %v181_v53 = vmax.f32 %v170_v50, 0.0 }
 0x12b   :  { %v172_v39 = vpop.f32.mrf.mxu1 }
 0x12c   :  { %v173_v47 = vadd.f32 %v172_v39, %v127_v46 }
 0x12e   :  { %v182_v52 = vmax.f32 %v173_v47, 0.0 }
 0x133   :  { %v175_v41 = vpop.f32.mrf.mxu1 }
 0x134   :  { %v176_v44 = vadd.f32 %v175_v41, %v132_v42 }
 0x136   :  { %v183_v51 = vmax.f32 %v176_v44, 0.0 }
 0x13b   :  { %v178_v43 = vpop.f32.mrf.mxu1 }
 0x13c   :  { %v179_v45 = vadd.f32 %v178_v43, %v137_v40 }
 0x13e   :  { %v184_v48 = vmax.f32 %v179_v45, 0.0 }
 0x140   :  { %237 = vmatpush.msra.mxu2 %v184_v48 }
 0x142   :  { %238 = vmatpush.msra.mxu2 %v183_v51 }
 0x144   :  { %239 = vmatpush.msra.mxu2 %v182_v52 }
 0x146   :  { %240 = vmatpush.msra.mxu2 %v181_v53 }
 0x147   :  { %361 = vmatmul.msk.f32.vlgmr.msra.gmra.mxu2 %vm139_vm1, %v185_v54 }
 0x14f   :  { %362 = vmatmul.msk.f32.gmra.mxu2 %vm139_vm1, %v186_v55 }
 0x157   :  { %363 = vmatmul.msk.f32.gmra.mxu2 %vm139_vm1, %v187_v56 }
 0x15f   :  { %364 = vmatmul.msk.f32.gmra.mxu2 %vm139_vm1, %v188_v57 }
 0x1ca   :  { %v242_v60 = vpop.f32.mrf.mxu2 }
 0x1cb   :  { %v243_v61 = vadd.f32 %v242_v60, %v196_v59 }
 0x1cd   :  { %v254_v62 = vmax.f32 %v243_v61, 0.0 }
 0x1cf   :  { %263 = vxpose.xlu0.b32.start [1/4] (short) (narrow) %v254_v62, 8 }
 0x1d2   :  { %v245_v0 = vpop.f32.mrf.mxu2 }
 0x1d3   :  { %v246_v1 = vadd.f32 %v245_v0, %v201_v63 }
 0x1d5   :  { %v255_v2 = vmax.f32 %v246_v1, 0.0 }
 0x1d7   :  { %264 = vxpose.xlu0.b32.cont [2/4] (short) (narrow) %v255_v2, 8 }
 0x1da   :  { %v248_v4 = vpop.f32.mrf.mxu2 }
 0x1db   :  { %v249_v5 = vadd.f32 %v248_v4, %v206_v3 }
 0x1dd   :  { %v256_v6 = vmax.f32 %v249_v5, 0.0 }
 0x1df   :  { %265 = vxpose.xlu0.b32.cont [3/4] (short) (narrow) %v256_v6, 8 }
 0x1e2   :  { %v251_v8 = vpop.f32.mrf.mxu2 }
 0x1e3   :  { %v252_v9 = vadd.f32 %v251_v8, %v211_v7 }
 0x1e5   :  { %v257_v10 = vmax.f32 %v252_v9, 0.0 }
 0x1e7   :  { %266 = vxpose.xlu0.b32.end [4/4] (short) (narrow) %v257_v10, 8 }
 0x273   :  { %v279_v11 = vpop.trf.xlu0 }
 0x274   :  { %366 = vmatmul.msk.f32.vlgmr.msra.gmra.mxu3 %vm139_vm1, %v279_v11 }
 0x2f7   :  { %v318_v13 = vpop.f32.mrf.mxu3 }
 0x2f8   :  { %v319_v14 = vadd.f32 %v373_v12, %v318_v13 }
 0x2fa   :  { %v322_v15 = vsel %vm321_vm2, %v319_v14, -inf }
 0x2fb   :  { %323 = vmax.xlane.f32.xlu1 %v322_v15 }
 0x36e   :  { %v324_v16 = vpop.xlane.xlu1 %323 }
 0x36f   :  { %v325_v17 = vsub.f32 %v319_v14, %v324_v16 }
 0x371   :  { %v326_v18 = vmul.f32 1.442695, %v325_v17 }
 0x373   :  { %374 = vpow2.f32 %v326_v18 }
 0x379   :  { %v375_v19 = vpop.eup %374 }
 0x37a   :  { %v328_v20 = vsel %vm321_vm2, %v375_v19, 0.0 }
 0x37b   :  { %329 = vadd.xlane.f32.xlu2 %v328_v20 }
 0x3ee   :  { %v330_v21 = vpop.xlane.xlu2 %329 }
 0x3ef   :  { %376 = vlog2.f32 %v330_v21 }
 0x3f5   :  { %v377_v22 = vpop.eup %376 }
 0x3f6   :  { %v332_v23 = vmul.f32 0.6931472, %v377_v22 }
 0x3f8   :  { %v333_v24 = vadd.f32 %v332_v23, %v324_v16 }
 0x3fa   :  { %v334_v25 = vsub.f32 %v319_v14, %v333_v24 }
 0x3fc   :  { %335 = vst.msk [vmem:[#allocation2] sm:$0x3] %vm321_vm2, %v334_v25 }
 0x3fd   :  { %346 = dma.vmem_to_hbm [thread:$0]  %s342_s8, 32, %s344_s1, [#allocation3]  }
 0x3fe   :  { %402 = dma.done.wait [#allocation3], 32  }
 0x3ff   :  { %403 = vsyncadd [#allocation3], 4294967264 }
 0x400   :  { %351 = vsyncpa [#allocation3], 1 }

</bundles_post_ra>
